<compile_context>
chip_gen: v7x
topology: tpu7x:2x2x1
jax: 0.10.0
libtpu: 0.0.40
codegen_flags: <defaults>
</compile_context>

<pallas_src>
import functools

import jax
import jax.numpy as jnp
from jax.experimental import pallas as pl
from jax.experimental.pallas import tpu as pltpu


def _ffn_kernel(x_ref, w0t_ref, b0_ref, w1t_ref, b1_ref, o_ref):
    # x_ref:  (1, CF_in, TL)        w0t_ref: (CF_hid, CF_in)   b0_ref: (CF_hid, 1)
    # w1t_ref:(CF_out, CF_hid)      b1_ref:  (CF_out, 1)       o_ref:  (1, CF_out, TL)
    x = x_ref[0]                                                   # (CF_in, TL), lane-dense
    h = jnp.dot(w0t_ref[...], x, preferred_element_type=jnp.float32) + b0_ref[...]
    # tanh GELU -> EUP slot (VALU is the scarce slot here, not HBM). Slight numeric
    # deviation (<~3e-3 abs) from PyTorch nn.GELU's exact erf default.
    h = jax.nn.gelu(h, approximate=True)
    y = jnp.dot(w1t_ref[...], h, preferred_element_type=jnp.float32) + b1_ref[...]
    o_ref[0] = y.astype(o_ref.dtype)                               # lane-dense store


def _pick_fold(n, c_in):
    # Smallest fold f dividing n such that f*c_in is a multiple of 8 (f32 sublanes).
    for f in (1, 2, 4, 8):
        if n % f == 0 and (f * c_in) % 8 == 0:
            return f
    return 1


def _pick_tile(hw, tile_l, want_split):
    if hw <= 128:
        return hw                                   # full (block == array dim is legal)
    cap = max(128, (tile_l // 128) * 128)
    if want_split:
        # Ensure >= 2 spatial blocks so both v7x TensorCores get work.
        half = max(128, (((hw + 1) // 2 + 127) // 128) * 128)
        cap = min(cap, half)
    full = max(128, (hw // 128) * 128)              # ragged last block is masked by Pallas
    return min(cap, full)


@functools.partial(jax.jit, static_argnames=("tile_l",))
def ffn_pallas(x_nchw, w0, b0, w1, b1, tile_l=16384):
    """x_nchw: (N, C_in, H, W). w0: (C_in, C_hid), b0: (C_hid,),
    w1: (C_hid, C_out), b1: (C_out,). Returns (N, C_out, H, W)."""
    n, c_in, hh, ww = x_nchw.shape
    c_hid = w0.shape[1]
    c_out = w1.shape[1]
    hw = hh * ww
    itemsize = jnp.dtype(x_nchw.dtype).itemsize

    # Fold pairs of batch images into the channel axis to fill the 8 f32 sublanes.
    f = _pick_fold(n, c_in)
    ng = n // f
    cf_in, cf_hid, cf_out = f * c_in, f * c_hid, f * c_out

    # NCHW -> (N/f, f*C_in, H*W) (see TODO(synk) about layouts in the header).
    x3 = x_nchw.reshape(ng, cf_in, hw)

    # Channel-major, block-diagonal weights (tiny; built once per call).
    w0t = jnp.transpose(w0)                                    # (C_hid, C_in)
    w1t = jnp.transpose(w1)                                    # (C_out, C_hid)
    w0t_blk = jnp.kron(jnp.eye(f, dtype=w0t.dtype), w0t)      # (CF_hid, CF_in)
    w1t_blk = jnp.kron(jnp.eye(f, dtype=w1t.dtype), w1t)      # (CF_out, CF_hid)
    b0c = jnp.tile(b0, f).reshape(cf_hid, 1)
    b1c = jnp.tile(b1, f).reshape(cf_out, 1)

    # Spatial tile: large multiple of 128 (or the full row). Shrink if the estimated
    # VMEM footprint (double-buffered I/O blocks + f32 hidden temporaries) won't fit.
    tl = _pick_tile(hw, tile_l, want_split=(ng < 2))

    def _vmem_need(t):
        io = 2 * (cf_in + cf_out) * t * itemsize               # 2x-double-buffered in/out
        hid = 8 * cf_hid * t * 4                               # hidden + elementwise temps
        return io + hid + (2 << 20)

    while tl > 128 and _vmem_need(tl) > (40 << 20):            # v5e/v7x-safe budget
        tl = max(128, ((tl // 2) // 128) * 128)
    vmem_limit = int(min(max(_vmem_need(tl), 32 << 20), 48 << 20))

    grid = (ng, pl.cdiv(hw, tl))

    # Advisory cost estimate for XLA scheduling around the custom call.
    m_total = n * hw
    flops = 2 * m_total * (c_in * c_hid + c_hid * c_out)
    transcendentals = m_total * c_hid                          # one tanh per hidden act
    bytes_accessed = itemsize * (m_total * (c_in + c_out)
                                 + cf_in * cf_hid + cf_hid * cf_out + cf_hid + cf_out)

    out3 = pl.pallas_call(
        _ffn_kernel,
        out_shape=jax.ShapeDtypeStruct((ng, cf_out, hw), x_nchw.dtype),
        grid_spec=pltpu.PrefetchScalarGridSpec(
            num_scalar_prefetch=0,
            grid=grid,
            in_specs=[
                pl.BlockSpec((1, cf_in, tl), lambda b, l: (b, 0, l)),
                pl.BlockSpec((cf_hid, cf_in), lambda b, l: (0, 0)),
                pl.BlockSpec((cf_hid, 1), lambda b, l: (0, 0)),
                pl.BlockSpec((cf_out, cf_hid), lambda b, l: (0, 0)),
                pl.BlockSpec((cf_out, 1), lambda b, l: (0, 0)),
            ],
            out_specs=pl.BlockSpec((1, cf_out, tl), lambda b, l: (b, 0, l)),
        ),
        compiler_params=pltpu.CompilerParams(
            dimension_semantics=("parallel", "parallel"),
            vmem_limit_bytes=vmem_limit),
        cost_estimate=pl.CostEstimate(
            flops=flops,
            transcendentals=transcendentals,
            bytes_accessed=bytes_accessed),
    )(x3, w0t_blk, b0c, w1t_blk, b1c)

    return out3.reshape(n, c_out, hh, ww)


def _reference_ffn(x_nchw, w0, b0, w1, b1, approximate):
    # Pure-JAX reference: 1x1 convs as channel matmuls.
    x_rows = jnp.transpose(x_nchw, (0, 2, 3, 1))
    h = jnp.einsum("nhwc,cd->nhwd", x_rows, w0) + b0
    h = jax.nn.gelu(h, approximate=approximate)
    y = jnp.einsum("nhwd,de->nhwe", h, w1) + b1
    return jnp.transpose(y, (0, 3, 1, 2))


if __name__ == "__main__":
    # Module config: inp_channels=4, out_channels=4, exp_ratio=4, act='gelu'
    inp_channels, out_channels, exp_ratio = 4, 4, 4
    hidden = out_channels * exp_ratio  # 16

    key = jax.random.PRNGKey(0)
    kx, kw0, kb0, kw1, kb1, kx2 = jax.random.split(key, 6)

    # Deterministic "synthetic checkpoint" parameter init.
    x = jax.random.normal(kx, (2, inp_channels, 16, 16), jnp.float32)
    w0 = jax.random.normal(kw0, (inp_channels, hidden), jnp.float32) * 0.1
    b0 = jax.random.normal(kb0, (hidden,), jnp.float32) * 0.01
    w1 = jax.random.normal(kw1, (hidden, out_channels), jnp.float32) * 0.1
    b1 = jax.random.normal(kb1, (out_channels,), jnp.float32) * 0.01

    out = jax.block_until_ready(ffn_pallas(x, w0, b0, w1, b1))
    assert out.shape == (2, out_channels, 16, 16)

    # Kernel math check (same tanh GELU).
    ref_tanh = _reference_ffn(x, w0, b0, w1, b1, approximate=True)
    assert jnp.allclose(out, ref_tanh, atol=1e-5, rtol=1e-5)
    # Deviation from PyTorch's exact-erf nn.GELU is small and bounded.
    ref_erf = _reference_ffn(x, w0, b0, w1, b1, approximate=False)
    assert jnp.allclose(out, ref_erf, atol=5e-3, rtol=0)

    # Odd batch exercises the unfolded (f=1) fallback path.
    x_odd = jax.random.normal(kx2, (3, inp_channels, 8, 8), jnp.float32)
    out_odd = jax.block_until_ready(ffn_pallas(x_odd, w0, b0, w1, b1))
    ref_odd = _reference_ffn(x_odd, w0, b0, w1, b1, approximate=True)
    assert out_odd.shape == (3, out_channels, 8, 8)
    assert jnp.allclose(out_odd, ref_odd, atol=1e-5, rtol=1e-5)

    print("KERNEL_OK")
</pallas_src>

<mosaic_0001>
module attributes {stable_mosaic.version = 11 : i64} {
  func.func @_ffn_kernel(%arg0: i32, %arg1: i32, %arg2: memref<1x8x128xf32, #tpu.memory_space<vmem>>, %arg3: memref<32x8xf32, #tpu.memory_space<vmem>>, %arg4: memref<32x1xf32, #tpu.memory_space<vmem>>, %arg5: memref<8x32xf32, #tpu.memory_space<vmem>>, %arg6: memref<8x1xf32, #tpu.memory_space<vmem>>, %arg7: memref<1x8x128xf32, #tpu.memory_space<vmem>>) attributes {dimension_semantics = [#tpu.dimension_semantics<parallel>, #tpu.dimension_semantics<parallel>], iteration_bounds = array<i64: 1, 2>, scalar_prefetch = 0 : i64, scratch_operands = 0 : i64, tpu.core_type = #tpu.core_type<tc>, window_params = [{transform_indices = @transform_0, window_bounds = array<i64: 1, 8, 128>}, {pipeline_mode = #tpu.pipeline_mode<synchronous>, transform_indices = @transform_1, window_bounds = array<i64: 32, 8>}, {pipeline_mode = #tpu.pipeline_mode<synchronous>, transform_indices = @transform_2, window_bounds = array<i64: 32, 1>}, {pipeline_mode = #tpu.pipeline_mode<synchronous>, transform_indices = @transform_3, window_bounds = array<i64: 8, 32>}, {pipeline_mode = #tpu.pipeline_mode<synchronous>, transform_indices = @transform_4, window_bounds = array<i64: 8, 1>}, {transform_indices = @transform_5, window_bounds = array<i64: 1, 8, 128>}]} {
    %c0 = arith.constant 0 : index
    %c0_0 = arith.constant 0 : index
    %c0_1 = arith.constant 0 : index
    %0 = vector.load %arg2[%c0, %c0_0, %c0_1] : memref<1x8x128xf32, #tpu.memory_space<vmem>>, vector<1x8x128xf32>
    %1 = vector.shape_cast %0 : vector<1x8x128xf32> to vector<8x128xf32>
    %c0_2 = arith.constant 0 : index
    %c0_3 = arith.constant 0 : index
    %2 = vector.load %arg3[%c0_2, %c0_3] : memref<32x8xf32, #tpu.memory_space<vmem>>, vector<32x8xf32>
    %cst = arith.constant dense<0.000000e+00> : vector<32x128xf32>
    %3 = tpu.matmul %2, %1, %cst {dimension_numbers = #tpu.dot_dimension_numbers<[1], [0], [0], [1], [0, 0, 1, 1], [], []>} : vector<32x8xf32>, vector<8x128xf32>, vector<32x128xf32> -> vector<32x128xf32>
    %c0_4 = arith.constant 0 : index
    %c0_5 = arith.constant 0 : index
    %4 = vector.load %arg4[%c0_4, %c0_5] : memref<32x1xf32, #tpu.memory_space<vmem>>, vector<32x1xf32>
    %5 = vector.broadcast %4 : vector<32x1xf32> to vector<32x128xf32>
    %6 = arith.addf %3, %5 : vector<32x128xf32>
    %7 = arith.mulf %6, %6 : vector<32x128xf32>
    %8 = arith.mulf %6, %7 : vector<32x128xf32>
    %cst_6 = arith.constant 4.471500e-02 : f32
    %9 = vector.broadcast %cst_6 : f32 to vector<32x128xf32>
    %10 = arith.mulf %9, %8 : vector<32x128xf32>
    %11 = arith.addf %6, %10 : vector<32x128xf32>
    %cst_7 = arith.constant 0.797884583 : f32
    %12 = vector.broadcast %cst_7 : f32 to vector<32x128xf32>
    %13 = arith.mulf %12, %11 : vector<32x128xf32>
    %14 = math.tanh %13 : vector<32x128xf32>
    %cst_8 = arith.constant 1.000000e+00 : f32
    %15 = vector.broadcast %cst_8 : f32 to vector<32x128xf32>
    %16 = arith.addf %15, %14 : vector<32x128xf32>
    %cst_9 = arith.constant 5.000000e-01 : f32
    %17 = vector.broadcast %cst_9 : f32 to vector<32x128xf32>
    %18 = arith.mulf %17, %16 : vector<32x128xf32>
    %19 = arith.mulf %6, %18 : vector<32x128xf32>
    %c0_10 = arith.constant 0 : index
    %c0_11 = arith.constant 0 : index
    %20 = vector.load %arg5[%c0_10, %c0_11] : memref<8x32xf32, #tpu.memory_space<vmem>>, vector<8x32xf32>
    %cst_12 = arith.constant dense<0.000000e+00> : vector<8x128xf32>
    %21 = tpu.matmul %20, %19, %cst_12 {dimension_numbers = #tpu.dot_dimension_numbers<[1], [0], [0], [1], [0, 0, 1, 1], [], []>} : vector<8x32xf32>, vector<32x128xf32>, vector<8x128xf32> -> vector<8x128xf32>
    %c0_13 = arith.constant 0 : index
    %c0_14 = arith.constant 0 : index
    %22 = vector.load %arg6[%c0_13, %c0_14] : memref<8x1xf32, #tpu.memory_space<vmem>>, vector<8x1xf32>
    %23 = vector.broadcast %22 : vector<8x1xf32> to vector<8x128xf32>
    %24 = arith.addf %21, %23 : vector<8x128xf32>
    %c0_15 = arith.constant 0 : index
    %c0_16 = arith.constant 0 : index
    %c0_17 = arith.constant 0 : index
    %25 = vector.load %arg7[%c0_15, %c0_16, %c0_17] : memref<1x8x128xf32, #tpu.memory_space<vmem>>, vector<1x8x128xf32>
    %26 = vector.shape_cast %25 : vector<1x8x128xf32> to vector<8x128xf32>
    %27 = vector.shape_cast %24 : vector<8x128xf32> to vector<1x8x128xf32>
    tpu.vector_store %arg7[%c0_15, %c0_16, %c0_17], %27 {strides = array<i32>} : memref<1x8x128xf32, #tpu.memory_space<vmem>>, vector<1x8x128xf32>,
    return
  }
  func.func @transform_0(%arg0: i32, %arg1: i32) -> (i32, i32, i32) {
    %c0_i32 = arith.constant 0 : i32
    %c0_i32_0 = arith.constant 0 : i32
    return %arg0, %c0_i32, %arg1 : i32, i32, i32
  }
  func.func @transform_1(%arg0: i32, %arg1: i32) -> (i32, i32) {
    %c0_i32 = arith.constant 0 : i32
    %c0_i32_0 = arith.constant 0 : i32
    %c0_i32_1 = arith.constant 0 : i32
    return %c0_i32, %c0_i32_0 : i32, i32
  }
  func.func @transform_2(%arg0: i32, %arg1: i32) -> (i32, i32) {
    %c0_i32 = arith.constant 0 : i32
    %c0_i32_0 = arith.constant 0 : i32
    %c0_i32_1 = arith.constant 0 : i32
    return %c0_i32, %c0_i32_0 : i32, i32
  }
  func.func @transform_3(%arg0: i32, %arg1: i32) -> (i32, i32) {
    %c0_i32 = arith.constant 0 : i32
    %c0_i32_0 = arith.constant 0 : i32
    %c0_i32_1 = arith.constant 0 : i32
    return %c0_i32, %c0_i32_0 : i32, i32
  }
  func.func @transform_4(%arg0: i32, %arg1: i32) -> (i32, i32) {
    %c0_i32 = arith.constant 0 : i32
    %c0_i32_0 = arith.constant 0 : i32
    %c0_i32_1 = arith.constant 0 : i32
    return %c0_i32, %c0_i32_0 : i32, i32
  }
  func.func @transform_5(%arg0: i32, %arg1: i32) -> (i32, i32, i32) {
    %c0_i32 = arith.constant 0 : i32
    %c0_i32_0 = arith.constant 0 : i32
    return %arg0, %c0_i32, %arg1 : i32, i32, i32
  }
}

</mosaic_0001>

<bundles_post_ra>
// kernel: tile.13
= control target key start
LH: loop header
LB: loop body
LE: loop exit
PB: predicated region body
PF: predicated region fallthrough
CT: control target
= control target key end

     0   :  { %s22_s0 = inlined_call_operand.vmem [shape: f32[16], index: 0, kind: input, shape index: {}]   ;;  %s23_s1 = inlined_call_operand.vmem [shape: f32[2,16], index: 1, kind: output, shape index: {}]  }
   0x1   :  { %v4_v0 = vld [vmem:[%s22_s0] ss:$0 sm:$0xff] }
   0x2   :  { %5 = vst [vmem:[%s23_s1] sm:$0x3] %v4_v0 }

// kernel: tile.18
= control target key start
LH: loop header
LB: loop body
LE: loop exit
PB: predicated region body
PF: predicated region fallthrough
CT: control target
= control target key end

     0   :  { %s22_s0 = inlined_call_operand.vmem [shape: f32[4], index: 0, kind: input, shape index: {}]   ;;  %s23_s1 = inlined_call_operand.vmem [shape: f32[2,4], index: 1, kind: output, shape index: {}]  }
   0x1   :  { %v4_v0 = vld [vmem:[%s22_s0] ss:$0 sm:$0xff] }
   0x2   :  { %5 = vst [vmem:[%s23_s1] sm:$0x3] %v4_v0 }

// kernel: tile.1
= control target key start
LH: loop header
LB: loop body
LE: loop exit
PB: predicated region body
PF: predicated region fallthrough
CT: control target
= control target key end

     0   :  { %s34_s8 = smov 125   ;;  %vm7_vm0 = vcmask 7168   ;;  %s35_s11 = smov 126   ;;  %s61_s0 = inlined_call_operand.vmem [shape: f32[2,4], index: 0, kind: input, shape index: {}]   ;;  %s62_s1 = inlined_call_operand.vmem [shape: f32[8,1], index: 1, kind: output, shape index: {}]  }
   0x1   :  { %v4_v0 = vld [vmem:[%s61_s0] sm:$0x3]  ;;  %s33_s0 = smov 127  }
   0x2   :  { %5 = vst [vmem:[#allocation0] sm:$0x3] %v4_v0 }
   0x9   :  { %v9_v1 = vld [vmem:[#allocation0] sm:$0x3]  }
   0xa   :  { %v21_v2 = vld [vmem:[#allocation0] sm:$0x3]   ;;  %10 = vrot.lane.b32.xlu0 %v9_v1, %s33_s0 }
   0xb   :  { %22 = vrot.lane.b32.xlu1 %v21_v2, %s34_s8  ;;  %v6_v3 = vld [vmem:[#allocation0] sm:$0x3]  }
   0xc   :  { %v15_v4 = vld [vmem:[#allocation0] sm:$0x3]   ;;  %8 = vst.msk [vmem:[%s62_s1] ss:$4 sm:$0x3] %vm7_vm0, %v6_v3  }
   0xe   :  { %16 = vrot.lane.b32.xlu0 %v15_v4, %s35_s11 }
  0x7c   :  { %v11_v5 = vpop.permute.xlu0 %10  }
  0x7d   :  { %v23_v6 = vpop.permute.xlu1 %22   ;;  %27 = vst.msk [vmem:[%s62_s1 + $0x1] ss:$4 sm:$0x3] %vm7_vm0, %v11_v5  }
  0x7e   :  { %29 = vst.msk [vmem:[%s62_s1 + $0x3] ss:$4 sm:$0x3] %vm7_vm0, %v23_v6  }
  0x80   :  { %v17_v7 = vpop.permute.xlu0 %16  }
  0x81   :  { %28 = vst.msk [vmem:[%s62_s1 + $0x2] ss:$4 sm:$0x3] %vm7_vm0, %v17_v7  }

// kernel: tile.0
= control target key start
LH: loop header
LB: loop body
LE: loop exit
PB: predicated region body
PF: predicated region fallthrough
CT: control target
= control target key end

     0   :  { %s130_s8 = smov 125   ;;  %s131_s9 = smov 126   ;;  %vm7_vm0 = vcmask 7168   ;;  %s221_s0 = inlined_call_operand.vmem [shape: f32[2,16], index: 0, kind: input, shape index: {}]   ;;  %s222_s1 = inlined_call_operand.vmem [shape: f32[32,1], index: 1, kind: output, shape index: {}]  }
   0x1   :  { %v4_v0 = vld [vmem:[%s221_s0] sm:$0x3]  ;;  %s129_s0 = smov 127   ;;  %s132_s10 = smov 124  }
   0x2   :  { %5 = vst [vmem:[#allocation0] sm:$0x3] %v4_v0  ;;  %s133_s11 = smov 123   ;;  %s134_s12 = smov 122  }
   0x3   :  { %s135_s13 = smov 121   ;;  %s136_s14 = smov 120  }
   0x4   :  { %s137_s17 = smov 119   ;;  %s138_s18 = smov 118  }
   0x5   :  { %s139_s19 = smov 117   ;;  %s140_s20 = smov 116  }
   0x6   :  { %s141_s21 = smov 115   ;;  %s142_s22 = smov 114  }
   0x7   :  { %s143_s23 = smov 113  }
   0x9   :  { %v9_v1 = vld [vmem:[#allocation0] sm:$0x3]  }
   0xa   :  { %v21_v2 = vld [vmem:[#allocation0] sm:$0x3]   ;;  %10 = vrot.lane.b32.xlu0 %v9_v1, %s129_s0 }
   0xb   :  { %22 = vrot.lane.b32.xlu1 %v21_v2, %s130_s8  ;;  %v15_v3 = vld [vmem:[#allocation0] sm:$0x3]  }
   0xc   :  { %v27_v4 = vld [vmem:[#allocation0] sm:$0x3]  }
   0xd   :  { %v33_v5 = vld [vmem:[#allocation0] sm:$0x3]  }
   0xe   :  { %16 = vrot.lane.b32.xlu0 %v15_v3, %s131_s9  ;;  %v39_v6 = vld [vmem:[#allocation0] sm:$0x3]  }
   0xf   :  { %28 = vrot.lane.b32.xlu1 %v27_v4, %s132_s10  ;;  %v45_v7 = vld [vmem:[#allocation0] sm:$0x3]  }
  0x10   :  { %v51_v8 = vld [vmem:[#allocation0] sm:$0x3]  }
  0x11   :  { %v57_v9 = vld [vmem:[#allocation0] sm:$0x3]  }
  0x12   :  { %34 = vrot.lane.b32.xlu0 %v33_v5, %s133_s11  ;;  %v63_v10 = vld [vmem:[#allocation0] sm:$0x3]  }
  0x13   :  { %40 = vrot.lane.b32.xlu1 %v39_v6, %s134_s12  ;;  %v6_v11 = vld [vmem:[#allocation0] sm:$0x3]  }
  0x14   :  { %8 = vst.msk [vmem:[%s222_s1] ss:$16 sm:$0x3] %vm7_vm0, %v6_v11   ;;  %v69_v12 = vld [vmem:[#allocation0] sm:$0x3]  }
  0x15   :  { %v75_v13 = vld [vmem:[#allocation0] sm:$0x3]  }
  0x16   :  { %46 = vrot.lane.b32.xlu0 %v45_v7, %s135_s13  ;;  %v81_v14 = vld [vmem:[#allocation0] sm:$0x3]  }
  0x17   :  { %52 = vrot.lane.b32.xlu1 %v51_v8, %s136_s14  ;;  %v87_v15 = vld [vmem:[#allocation0] sm:$0x3]  }
  0x18   :  { %v93_v16 = vld [vmem:[#allocation0] sm:$0x3]  }
  0x1a   :  { %58 = vrot.lane.b32.xlu0 %v57_v9, %s137_s17 }
  0x1b   :  { %64 = vrot.lane.b32.xlu1 %v63_v10, %s138_s18 }
  0x1e   :  { %70 = vrot.lane.b32.xlu0 %v69_v12, %s139_s19 }
  0x1f   :  { %76 = vrot.lane.b32.xlu1 %v75_v13, %s140_s20 }
  0x22   :  { %82 = vrot.lane.b32.xlu0 %v81_v14, %s141_s21 }
  0x23   :  { %88 = vrot.lane.b32.xlu1 %v87_v15, %s142_s22 }
  0x26   :  { %94 = vrot.lane.b32.xlu0 %v93_v16, %s143_s23 }
  0x7c   :  { %v11_v17 = vpop.permute.xlu0 %10  }
  0x7d   :  { %v23_v18 = vpop.permute.xlu1 %22   ;;  %99 = vst.msk [vmem:[%s222_s1 + $0x1] ss:$16 sm:$0x3] %vm7_vm0, %v11_v17  }
  0x7e   :  { %101 = vst.msk [vmem:[%s222_s1 + $0x3] ss:$16 sm:$0x3] %vm7_vm0, %v23_v18  }
  0x80   :  { %v17_v19 = vpop.permute.xlu0 %16  }
  0x81   :  { %v29_v20 = vpop.permute.xlu1 %28   ;;  %100 = vst.msk [vmem:[%s222_s1 + $0x2] ss:$16 sm:$0x3] %vm7_vm0, %v17_v19  }
  0x82   :  { %102 = vst.msk [vmem:[%s222_s1 + $0x4] ss:$16 sm:$0x3] %vm7_vm0, %v29_v20  }
  0x84   :  { %v35_v21 = vpop.permute.xlu0 %34  }
  0x85   :  { %v41_v22 = vpop.permute.xlu1 %40   ;;  %103 = vst.msk [vmem:[%s222_s1 + $0x5] ss:$16 sm:$0x3] %vm7_vm0, %v35_v21  }
  0x86   :  { %104 = vst.msk [vmem:[%s222_s1 + $0x6] ss:$16 sm:$0x3] %vm7_vm0, %v41_v22  }
  0x88   :  { %v47_v23 = vpop.permute.xlu0 %46  }
  0x89   :  { %v53_v24 = vpop.permute.xlu1 %52   ;;  %105 = vst.msk [vmem:[%s222_s1 + $0x7] ss:$16 sm:$0x3] %vm7_vm0, %v47_v23  }
  0x8a   :  { %106 = vst.msk [vmem:[%s222_s1 + $0x8] ss:$16 sm:$0x3] %vm7_vm0, %v53_v24  }
  0x8c   :  { %v59_v25 = vpop.permute.xlu0 %58  }
  0x8d   :  { %v65_v26 = vpop.permute.xlu1 %64   ;;  %107 = vst.msk [vmem:[%s222_s1 + $0x9] ss:$16 sm:$0x3] %vm7_vm0, %v59_v25  }
  0x8e   :  { %108 = vst.msk [vmem:[%s222_s1 + $0xa] ss:$16 sm:$0x3] %vm7_vm0, %v65_v26  }
  0x90   :  { %v71_v27 = vpop.permute.xlu0 %70  }
  0x91   :  { %v77_v28 = vpop.permute.xlu1 %76   ;;  %109 = vst.msk [vmem:[%s222_s1 + $0xb] ss:$16 sm:$0x3] %vm7_vm0, %v71_v27  }
  0x92   :  { %110 = vst.msk [vmem:[%s222_s1 + $0xc] ss:$16 sm:$0x3] %vm7_vm0, %v77_v28  }
  0x94   :  { %v83_v29 = vpop.permute.xlu0 %82  }
  0x95   :  { %v89_v30 = vpop.permute.xlu1 %88   ;;  %111 = vst.msk [vmem:[%s222_s1 + $0xd] ss:$16 sm:$0x3] %vm7_vm0, %v83_v29  }
  0x96   :  { %112 = vst.msk [vmem:[%s222_s1 + $0xe] ss:$16 sm:$0x3] %vm7_vm0, %v89_v30  }
  0x98   :  { %v95_v31 = vpop.permute.xlu0 %94  }
  0x99   :  { %113 = vst.msk [vmem:[%s222_s1 + $0xf] ss:$16 sm:$0x3] %vm7_vm0, %v95_v31  }

// kernel: ffn_pallas.1
= control target key start
LH: loop header
LB: loop body
LE: loop exit
PB: predicated region body
PF: predicated region fallthrough
CT: control target
= control target key end

     0   :  { %s729_s18 = smov 0   ;;  %s731_s19 = smov 0   ;;  %s803_s0 = inlined_call_operand.vmem [shape: f32[1,8,256], index: 0, kind: input, shape index: {}]   ;;  %s804_s1 = inlined_call_operand.vmem [shape: f32[32,8], index: 1, kind: input, shape index: {}]   ;;  %s805_s2 = inlined_call_operand.vmem [shape: f32[32,1], index: 2, kind: input, shape index: {}]   ;;  %s806_s3 = inlined_call_operand.vmem [shape: f32[8,32], index: 3, kind: input, shape index: {}]   ;;  %s807_s4 = inlined_call_operand.vmem [shape: f32[8,1], index: 4, kind: input, shape index: {}]   ;;  %s808_s5 = inlined_call_operand.vmem [shape: f32[1,8,256], index: 5, kind: output, shape index: {}]  }
   0x1   :  { %s733_s20 = smov 0  }
   0x2 LB: > { %s24_s21 = sadd.s32 1, %s689_s19  ;;  %p588_p0 = scmp.ge.s32.totalorder %s693_s20, 1  ;;  %s693_s20 = sphi %s733_s20, %s15_s20   ;;  %s689_s19 = sphi %s731_s19, %s810_s19   ;;  %s685_s18 = sphi %s729_s18, %s809_s18  }
   0x3   : > { %p25_p1 = scmp.ge.s32.totalorder %s24_s21, 2  ;;  %p206_p2 = scmp.lt.s32.totalorder %s693_s20, 3 }
   0x5   : > { %s812_s21 = smov (%p25_p1, %s24_s21), 0  ;;  %p207_p3 = pnand %p588_p0, %p206_p2 }
   0x6   : > { %p242_p4 = scmp.lt.s32.totalorder (!%p207_p3), %s685_s18, 1  ;;  %v257_v0 = vld [vmem:[%s804_s1] sm:$0xff] (!%p207_p3)  ;;  %vm285_vm0 = vcmask (!%p207_p3), 64512   ;;  %v695_v1 = vmov (!%p207_p3), 0   ;;  %v263_v3 = vld [vmem:[%s805_s2 + $0x10] sm:$0xff] (!%p207_p3)  ;;  %v262_v4 = vld [vmem:[%s805_s2 + $0x8] sm:$0xff] (!%p207_p3) }
   0x7   : > { %210 = sbr.rel (%p207_p3) target bundleno = 486 (0x1e6), region = 40  ;;  %610 = vmatprep.mubr.msk.f32.mxu0 (!%p207_p3), %vm285_vm0, %v257_v0  ;;  %661 = vset.pattern.permute.xlu0 (!%p207_p3), %v695_v1  ;;  %v261_v2 = vld [vmem:[%s805_s2] sm:$0xff] (!%p207_p3)  ;;  %v264_v5 = vld [vmem:[%s805_s2 + $0x18] sm:$0xff] (!%p207_p3)  ;;  %v258_v7 = vld [vmem:[%s804_s1 + $0x8] sm:$0xff] (!%p207_p3)  ;;  %v696_v11 = vmov (!%p207_p3), 0.0|0.0   ;;  %vm697_vm1 = vmmov (!%p207_p3), 0  }
   0x8   : > { %267 = vperm.xlu0 (!%p207_p3), %661, %v261_v2   ;;  %662 = vset.pattern.permute.xlu1 (!%p207_p3), %v695_v1  ;;  %v259_v8 = vld [vmem:[%s804_s1 + $0x10] sm:$0xff] (!%p207_p3)  ;;  %v420_v9 = vld [vmem:[%s807_s4] sm:$0xff] (!%p207_p3)  ;;  %v260_v10 = vld [vmem:[%s804_s1 + $0x18] sm:$0xff] (!%p207_p3)  ;;  %v698_v12 = vmov (!%p207_p3), 0.0   ;;  %vm426_vm2 = vcmask (!%p207_p3), 261120  }
   0x9   : > { %277 = vperm.xlu1 (!%p207_p3), %662, %v263_v3   ;;  %627 = vmatprep.subr.bf16.mxu1 (!%p207_p3), %v696_v11  ;;  %v419_v63 = vld [vmem:[%s806_s3] sm:$0xff] (!%p207_p3) }
   0xa   : > { %624 = vmatprep.mubr.msk.f32.mxu1 (!%p207_p3), %vm697_vm1, %v698_v12 }
   0xc   : > { %272 = vperm.xlu0 (!%p207_p3), %661, %v262_v4  }
   0xd   : > { %282 = vperm.xlu1 (!%p207_p3), %662, %v264_v5  }
   0xe   : > { %s814_s18 = smov (!%p242_p4, %s685_s18), 1 }
   0xf   : > { %s589_s30 = sshll.u32 %s814_s18, 3 }
  0x10   : > { %s247_s10 = scalar_lea.vmem %s803_s0, %s589_s30  ;;  %423 = vperm.xlu0 %661, %v420_v9   ;;  %s255_s27 = scalar_lea.vmem %s808_s5, %s589_s30 }
  0x11   : > { %v256_v6 = vld [vmem:[%s247_s10] sm:$0xff] }
  0x12   : > { %608 = vmatprep.subr.mxu0 %v256_v6 }
  0x13   : > { %609 = vmatpush3.msra.mxu0 %v256_v6 }
  0x14   : > { %611 = vmatmul.mubr.msk.f32.vlgmr.msra.gmra.mrb[0].mxu0 %vm285_vm0, %v258_v7 }
  0x15   : > { %613 = vmatprep.mubr.msk.f32.mxu0 %vm285_vm0, %v259_v8 }
  0x18   : > { %614 = vmatmul.mubr.msk.f32.gmra.mrb[2].mxu0 %vm285_vm0, %v260_v10 }
  0x87   : > { %v268_v13 = vpop.permute.xlu0 %267 }
  0x88   : > { %v278_v14 = vpop.permute.xlu1 %277 }
  0x8b   : > { %v273_v15 = vpop.permute.xlu0 %272 }
  0x8c   : > { %v283_v21 = vpop.permute.xlu1 %282 }
  0x8f   : > { %v424_v0 = vpop.permute.xlu0 %423 }
  0xe7   : > { %v612_v16 = vpop.f32.mrb[0].mxu0 }
  0xe8   : > { %v370_v17 = vadd.f32 %v612_v16, %v273_v15  ;;  %v364_v18 = vpop.f32.mrb[1].mxu0 }
  0xe9   : > { %v365_v19 = vadd.f32 %v364_v18, %v268_v13 }
  0xea   : > { %v384_v20 = vmul.f32 %v370_v17, %v370_v17 }
  0xeb   : > { %v383_v22 = vmul.f32 %v365_v19, %v365_v19  ;;  %v615_v23 = vpop.f32.mrb[2].mxu0 }
  0xec   : > { %v388_v24 = vmul.f32 %v384_v20, %v370_v17  ;;  %v380_v25 = vadd.f32 %v615_v23, %v283_v21  ;;  %v374_v26 = vpop.f32.mrb[3].mxu0 }
  0xed   : > { %v387_v27 = vmul.f32 %v383_v22, %v365_v19  ;;  %v375_v28 = vadd.f32 %v374_v26, %v278_v14 }
  0xee   : > { %v392_v29 = vmul.f32 0.044715, %v388_v24  ;;  %v386_v30 = vmul.f32 %v380_v25, %v380_v25 }
  0xef   : > { %v391_v31 = vmul.f32 0.044715, %v387_v27  ;;  %v385_v32 = vmul.f32 %v375_v28, %v375_v28 }
  0xf0   : > { %v396_v33 = vadd.f32 %v392_v29, %v370_v17  ;;  %v390_v34 = vmul.f32 %v386_v30, %v380_v25 }
  0xf1   : > { %v395_v35 = vadd.f32 %v391_v31, %v365_v19  ;;  %v389_v36 = vmul.f32 %v385_v32, %v375_v28 }
  0xf2   : > { %v400_v37 = vmul.f32 0.7978846, %v396_v33  ;;  %v394_v38 = vmul.f32 0.044715, %v390_v34 }
  0xf3   : > { %v399_v39 = vmul.f32 0.7978846, %v395_v35  ;;  %v393_v40 = vmul.f32 0.044715, %v389_v36 }
  0xf4   : > { %v398_v41 = vadd.f32 %v394_v38, %v380_v25  ;;  %663 = vtanh.f32 %v400_v37 }
  0xf5   : > { %v397_v42 = vadd.f32 %v393_v40, %v375_v28  ;;  %665 = vtanh.f32 %v399_v39 }
  0xf6   : > { %v402_v43 = vmul.f32 0.7978846, %v398_v41 }
  0xf7   : > { %v401_v44 = vmul.f32 0.7978846, %v397_v42 }
  0xf8   : > { %667 = vtanh.f32 %v402_v43 }
  0xf9   : > { %669 = vtanh.f32 %v401_v44 }
  0xfe   : > { %v664_v45 = vpop.eup %663 }
  0xff   : > { %v666_v46 = vpop.eup %665  ;;  %v408_v47 = vadd.f32 1.0, %v664_v45 }
 0x100   : > { %v407_v48 = vadd.f32 1.0, %v666_v46 }
 0x101   : > { %v412_v49 = vmul.f32 0.5, %v408_v47 }
 0x102   : > { %v668_v50 = vpop.eup %667  ;;  %v411_v51 = vmul.f32 0.5, %v407_v48 }
 0x103   : > { %v670_v52 = vpop.eup %669  ;;  %v416_v53 = vmul.f32 %v412_v49, %v370_v17  ;;  %v410_v54 = vadd.f32 1.0, %v668_v50 }
 0x104   : > { %v415_v55 = vmul.f32 %v411_v51, %v365_v19  ;;  %v409_v56 = vadd.f32 1.0, %v670_v52 }
 0x105   : > { %v414_v57 = vmul.f32 0.5, %v410_v54 }
 0x106   : > { %v628_v58 = vpack.c.bf16 %v416_v53, %v415_v55  ;;  %v413_v59 = vmul.f32 0.5, %v409_v56 }
 0x107   : > { %v418_v60 = vmul.f32 %v414_v57, %v380_v25 }
 0x108   : > { %629 = vmatpush3.bf16.msra.mxu1 %v628_v58  ;;  %v417_v61 = vmul.f32 %v413_v59, %v375_v28 }
 0x109   : > { %630 = vmatprep.subr.bf16.mxu1 %v696_v11 }
 0x10a   : > { %v631_v62 = vpack.c.bf16 %v418_v60, %v417_v61 }
 0x10c   : > { %632 = vmatpush3.bf16.msra.mxu1 %v631_v62 }
 0x10f   : > { %625 = vmatmul.mubr.msk.f32.vlgmr.msra.gmra.mrb[0].mxu1 %vm426_vm2, %v419_v63 }
 0x1e2   : > { %v496_v1 = vpop.f32.mrb[0].mxu1 }
 0x1e3   : > { %v497_v2 = vadd.f32 %v496_v1, %v424_v0  ;;  %v626_v3 = vpop.f32.mrb[1].mxu1 }
 0x1e5   : > { %500 = vst [vmem:[%s255_s27] sm:$0xff] %v497_v2 }
 0x1e6 PF: > { %s15_s20 = sadd.s32 1, %s693_s20   ;;  %s809_s18 = smov %s689_s19 }
 0x1e7   : > { %p12_p5 = scmp.ge.s32.totalorder %s15_s20, 4   ;;  %s810_s19 = smov %s812_s21 }
 0x1e9   :  { %14 = sbr.rel (!%p12_p5) target bundleno = 2 (0x2), region = 70 }

</bundles_post_ra>
